<compile_context>
chip_gen: v6e
topology: v6e:2x2x1
jax: 0.10.0
libtpu: 0.0.40
codegen_flags: <defaults>
</compile_context>

<pallas_src>
import functools

import jax
import jax.numpy as jnp
from jax import lax
from jax.experimental import pallas as pl
from jax.experimental.pallas import tpu as pltpu


def _round_up(x, m):
    return (x + m - 1) // m * m


# ----------------------------------------------------------------------------
# Fused GEMM kernels (single K step — full-K weight tiles):
#   out = maybe_relu((x @ w) * scale + bias [+ residual])
# x arrives f32/bf16 and is cast to bf16; w is bf16 or int8 (dequant scale is
# pre-folded into `scale`); MXU accumulates f32; epilogue is f32.
# ----------------------------------------------------------------------------
def _to_bf16(v):
    if v.dtype == jnp.bfloat16:
        return v
    if jnp.issubdtype(v.dtype, jnp.integer):
        # int8 weights: sign-extend -> f32 -> bf16 (values <= 127 are exact).
        return v.astype(jnp.float32).astype(jnp.bfloat16)
    return v.astype(jnp.bfloat16)


def _gemm_kernel(x_ref, w_ref, s_ref, b_ref, o_ref, *, relu):
    acc = jnp.dot(_to_bf16(x_ref[...]), _to_bf16(w_ref[...]),
                  preferred_element_type=jnp.float32)
    out = acc * s_ref[...] + b_ref[...]
    if relu:
        out = jnp.maximum(out, 0.0)
    o_ref[...] = out.astype(o_ref.dtype)


def _gemm_res_kernel(x_ref, w_ref, s_ref, b_ref, r_ref, o_ref, *, relu):
    acc = jnp.dot(_to_bf16(x_ref[...]), _to_bf16(w_ref[...]),
                  preferred_element_type=jnp.float32)
    out = acc * s_ref[...] + b_ref[...] + r_ref[...].astype(jnp.float32)
    if relu:
        out = jnp.maximum(out, 0.0)
    o_ref[...] = out.astype(o_ref.dtype)


# ----------------------------------------------------------------------------
# Parameter prep (done ONCE): pad to TPU-friendly shapes, cast weights to bf16
# (or weight-only int8 with the dequant scale folded into the BN scale).
# ----------------------------------------------------------------------------
def prep_gemm(w, scale, bias, quantize_int8=False):
    """w:(K,N) f32, scale/bias:(N,) f32 -> prepped dict (padded weight)."""
    K, N = w.shape
    Kp, Np = _round_up(K, 128), _round_up(N, 128)
    wp = jnp.pad(w.astype(jnp.float32), ((0, Kp - K), (0, Np - N)))
    s = jnp.pad(scale.astype(jnp.float32), (0, Np - N))
    b = jnp.pad(bias.astype(jnp.float32), (0, Np - N))
    if quantize_int8:
        # Symmetric per-output-channel weight quantization; dequant folded into s.
        wmax = jnp.max(jnp.abs(wp), axis=0)
        qscale = jnp.where(wmax > 0.0, wmax / 127.0, 1.0)
        wq = jnp.clip(jnp.round(wp / qscale), -127.0, 127.0).astype(jnp.int8)
        wp = wq
        s = s * qscale
    else:
        wp = wp.astype(jnp.bfloat16)
    return dict(w=wp, s=s.reshape(1, Np), b=b.reshape(1, Np), N=N, K=K)


def _pick_tn(Np):
    """Largest tn (multiple of 128, divides Np) that still gives >= 2 N tiles."""
    if Np <= 128:
        return Np
    for t in (512, 384, 256, 128):
        if t < Np and Np % t == 0:
            return t
    return Np


def _pad2d(x, Mp, Kp):
    M, K = x.shape
    if M == Mp and K == Kp:
        return x
    return jnp.pad(x, ((0, Mp - M), (0, Kp - K)))


def pallas_gemm(x, g, *, relu=False, residual=None,
                out_dtype=jnp.bfloat16, keep_padded=False):
    """x:(M,K), g: prepped weight dict, residual: optional (M,N)."""
    M, K = x.shape
    N = g['N']
    Kp, Np = g['w'].shape

    # Tiling: tiny-M friendly, full-K tiles (no reduction axis), lane-wide N tiles.
    Mp = _round_up(M, 8)
    tm = 128 if Mp >= 128 else Mp
    Mp = _round_up(Mp, tm)
    tn = _pick_tn(Np)

    xp = _pad2d(x, Mp, Kp)

    in_specs = [
        pl.BlockSpec((tm, Kp), lambda i, j: (i, 0)),
        pl.BlockSpec((Kp, tn), lambda i, j: (0, j)),
        pl.BlockSpec((1, tn), lambda i, j: (0, j)),
        pl.BlockSpec((1, tn), lambda i, j: (0, j)),
    ]
    args = [xp, g['w'], g['s'], g['b']]
    if residual is not None:
        rp = _pad2d(residual, Mp, Np)
        in_specs.append(pl.BlockSpec((tm, tn), lambda i, j: (i, j)))
        args.append(rp)
        kernel = functools.partial(_gemm_res_kernel, relu=relu)
    else:
        kernel = functools.partial(_gemm_kernel, relu=relu)

    out = pl.pallas_call(
        kernel,
        out_shape=jax.ShapeDtypeStruct((Mp, Np), out_dtype),
        grid_spec=pltpu.PrefetchScalarGridSpec(
            num_scalar_prefetch=0,
            grid=(Mp // tm, Np // tn),
            in_specs=in_specs,
            out_specs=pl.BlockSpec((tm, tn), lambda i, j: (i, j)),
        ),
        compiler_params=pltpu.CompilerParams(
            dimension_semantics=("parallel", "parallel"),
            vmem_limit_bytes=32 * 1024 * 1024),
    )(*args)
    if keep_padded or (M == Mp and N == Np):
        return out
    return out[:M, :N]


# ----------------------------------------------------------------------------
# Conv2d (no bias) + folded BN (+ optional ReLU / fused residual)
# via im2col + Pallas GEMM.
# ----------------------------------------------------------------------------
def prep_conv(w, scale, bias):
    kh, kw, cin, cout = w.shape
    g = prep_gemm(w.reshape(kh * kw * cin, cout), scale, bias)
    g['kh'], g['kw'] = kh, kw
    return g


def conv2d_bn(x, g, stride, padding, relu, residual=None):
    B, H, W, Cin = x.shape
    kh, kw = g['kh'], g['kw']
    Cout = g['N']
    if padding:
        x = jnp.pad(x, ((0, 0), (padding, padding), (padding, padding), (0, 0)))
    OH = (H + 2 * padding - kh) // stride + 1
    OW = (W + 2 * padding - kw) // stride + 1
    patches = []
    for i in range(kh):
        for j in range(kw):
            patches.append(lax.slice(
                x, (0, i, j, 0),
                (B, i + (OH - 1) * stride + 1, j + (OW - 1) * stride + 1, Cin),
                (1, stride, stride, 1)))
    pat = jnp.concatenate(patches, axis=-1).reshape(B * OH * OW, kh * kw * Cin)
    res2d = None if residual is None else residual.reshape(B * OH * OW, Cout)
    out = pallas_gemm(pat, g, relu=relu, residual=res2d, out_dtype=jnp.bfloat16)
    return out.reshape(B, OH, OW, Cout)


def bn_fold(bn, lin_bias=None, eps=1e-5):
    """Fold eval-mode BatchNorm (and optional preceding linear bias) into (scale, bias)."""
    s = bn['gamma'] / jnp.sqrt(bn['var'] + eps)
    pre = -bn['mean'] if lin_bias is None else (lin_bias - bn['mean'])
    return s, pre * s + bn['beta']


# ----------------------------------------------------------------------------
# Deterministic parameter initialization (raw params)
# ----------------------------------------------------------------------------
class PRNG:
    def __init__(self, key):
        self.key = key

    def next(self):
        self.key, k = jax.random.split(self.key)
        return k


def init_conv(rng, kh, kw, cin, cout):
    fan_in = kh * kw * cin
    return jax.random.normal(rng.next(), (kh, kw, cin, cout),
                             jnp.float32) * (2.0 / fan_in) ** 0.5


def init_bn(rng, c):
    return dict(
        gamma=1.0 + 0.1 * jax.random.normal(rng.next(), (c,), jnp.float32),
        beta=0.1 * jax.random.normal(rng.next(), (c,), jnp.float32),
        mean=0.05 * jax.random.normal(rng.next(), (c,), jnp.float32),
        var=1.0 + 0.1 * jnp.abs(jax.random.normal(rng.next(), (c,), jnp.float32)),
    )


def init_linear(rng, fin, fout):
    w = jax.random.normal(rng.next(), (fin, fout), jnp.float32) * (1.0 / fin) ** 0.5
    b = 0.01 * jax.random.normal(rng.next(), (fout,), jnp.float32)
    return w, b


def init_resnet18(rng):
    p = {'conv1_w': init_conv(rng, 7, 7, 3, 64), 'bn1': init_bn(rng, 64)}
    cfgs = [(64, 64, 1), (64, 128, 2), (128, 256, 2), (256, 512, 2)]
    layers = []
    for cin, cout, stride in cfgs:
        blocks = []
        for bi in range(2):
            s = stride if bi == 0 else 1
            in_c = cin if bi == 0 else cout
            blk = dict(
                stride=s,
                conv1_w=init_conv(rng, 3, 3, in_c, cout), bn1=init_bn(rng, cout),
                conv2_w=init_conv(rng, 3, 3, cout, cout), bn2=init_bn(rng, cout),
            )
            if s != 1 or in_c != cout:
                blk['down_w'] = init_conv(rng, 1, 1, in_c, cout)
                blk['down_bn'] = init_bn(rng, cout)
            blocks.append(blk)
        layers.append(blocks)
    p['layers'] = layers
    return p


def init_mlp(rng, d0, d1, d2, d3):
    w1, b1 = init_linear(rng, d0, d1)
    w2, b2 = init_linear(rng, d1, d2)
    w3, b3 = init_linear(rng, d2, d3)
    return dict(w1=w1, b1=b1, bn1=init_bn(rng, d1),
                w2=w2, b2=b2, bn2=init_bn(rng, d2),
                w3=w3, b3=b3)


def init_same_model(key):
    rng = PRNG(key)
    return dict(
        face=init_resnet18(rng),
        eye=init_resnet18(rng),      # shared for left & right eye
        grid=init_resnet18(rng),
        fc_combined=init_mlp(rng, 512 * 4, 3072, 3072, 8 + 512),
        fc_output=init_mlp(rng, 512 + 8, 3072, 3072, 32 * 32),
    )


# ----------------------------------------------------------------------------
# One-time prep: fold BN, pad weights; convs -> bf16, big FCs -> weight-only int8.
# ----------------------------------------------------------------------------
def prepare_resnet(p):
    q = {'conv1': prep_conv(p['conv1_w'], *bn_fold(p['bn1'])), 'layers': []}
    for blocks in p['layers']:
        qblocks = []
        for blk in blocks:
            qb = dict(
                stride=blk['stride'],
                conv1=prep_conv(blk['conv1_w'], *bn_fold(blk['bn1'])),
                conv2=prep_conv(blk['conv2_w'], *bn_fold(blk['bn2'])),
            )
            if 'down_w' in blk:
                qb['down'] = prep_conv(blk['down_w'], *bn_fold(blk['down_bn']))
            qblocks.append(qb)
        q['layers'].append(qblocks)
    return q


def prepare_mlp(p):
    ones = jnp.ones((p['w3'].shape[1],), jnp.float32)
    return dict(
        l1=prep_gemm(p['w1'], *bn_fold(p['bn1'], p['b1']), quantize_int8=True),
        l2=prep_gemm(p['w2'], *bn_fold(p['bn2'], p['b2']), quantize_int8=True),
        l3=prep_gemm(p['w3'], ones, p['b3'], quantize_int8=True),
    )


def prepare_same_model(p):
    return dict(
        face=prepare_resnet(p['face']),
        eye=prepare_resnet(p['eye']),
        grid=prepare_resnet(p['grid']),
        fc_combined=prepare_mlp(p['fc_combined']),
        fc_output=prepare_mlp(p['fc_output']),
    )


# ----------------------------------------------------------------------------
# Forward pass
# ----------------------------------------------------------------------------
def resnet18_features(q, x_nchw):
    x = jnp.transpose(x_nchw, (0, 2, 3, 1)).astype(jnp.bfloat16)   # NCHW -> NHWC bf16
    x = conv2d_bn(x, q['conv1'], stride=2, padding=3, relu=True)
    # maxpool 3x3 / stride 2 / pad 1  (cheap window reduction kept as XLA glue)
    x = lax.reduce_window(x, jnp.asarray(-jnp.inf, x.dtype), lax.max,
                          (1, 3, 3, 1), (1, 2, 2, 1),
                          ((0, 0), (1, 1), (1, 1), (0, 0)))
    for blocks in q['layers']:
        for blk in blocks:
            if 'down' in blk:
                identity = conv2d_bn(x, blk['down'], stride=blk['stride'],
                                     padding=0, relu=False)
            else:
                identity = x
            out = conv2d_bn(x, blk['conv1'], stride=blk['stride'],
                            padding=1, relu=True)
            # conv2 + BN + residual add + ReLU, all fused in one GEMM epilogue.
            x = conv2d_bn(out, blk['conv2'], stride=1, padding=1, relu=True,
                          residual=identity)
    # adaptive avg pool (1,1) + flatten (f32 for the feature heads)
    x = jnp.mean(x.astype(jnp.float32), axis=(1, 2))
    return x                                       # (B, 512) f32


def mlp_forward(q, x):
    # Linear + BN + ReLU (+ Dropout==identity in eval), twice, then plain Linear.
    # Padded (Mp, Np) shapes flow between the back-to-back GEMMs; slice at the end.
    M = x.shape[0]
    h = pallas_gemm(x, q['l1'], relu=True, keep_padded=True)
    h = pallas_gemm(h, q['l2'], relu=True, keep_padded=True)
    out = pallas_gemm(h, q['l3'], relu=False, keep_padded=True,
                      out_dtype=jnp.float32)
    return out[:M, :q['l3']['N']]


def same_model_forward(q, face, left, right, grid, cali):
    face_feature = resnet18_features(q['face'], face)
    # Shared eye backbone: one batched call (weights streamed once for both eyes).
    B = left.shape[0]
    eye_feature = resnet18_features(q['eye'], jnp.concatenate([left, right], axis=0))
    left_feature, right_feature = eye_feature[:B], eye_feature[B:]
    grid_feature = resnet18_features(q['grid'], grid)
    cat_feature = jnp.concatenate(
        [face_feature, left_feature, right_feature, grid_feature], axis=1)   # (B, 2048)
    fc1_out = mlp_forward(q['fc_combined'], cat_feature)                     # (B, 520)
    c, fc2_input = fc1_out[:, :8], fc1_out[:, 8:]                            # split [8, 512]
    fc2_input = jnp.concatenate([fc2_input, cali.astype(jnp.float32)], axis=1)  # (B, 520)
    gaze_out_heatmap = mlp_forward(q['fc_output'], fc2_input)                # (B, 1024)
    return c, gaze_out_heatmap


if __name__ == "__main__":
    key = jax.random.PRNGKey(0)
    kp, kf, kl, kr, kg, kc = jax.random.split(key, 6)
    raw_params = init_same_model(kp)
    params = prepare_same_model(raw_params)   # fold BN, pad, bf16/int8 weights once

    B = 2
    face = jax.random.normal(kf, (B, 3, 32, 32), jnp.float32)
    left = jax.random.normal(kl, (B, 3, 32, 32), jnp.float32)
    right = jax.random.normal(kr, (B, 3, 32, 32), jnp.float32)
    grid = jax.random.normal(kg, (B, 3, 32, 32), jnp.float32)
    cali = jax.random.normal(kc, (B, 8), jnp.float32)

    c, heatmap = same_model_forward(params, face, left, right, grid, cali)
    jax.block_until_ready((c, heatmap))
    assert c.shape == (B, 8) and heatmap.shape == (B, 32 * 32)
    assert jnp.all(jnp.isfinite(c)) and jnp.all(jnp.isfinite(heatmap))
    print("KERNEL_OK")
</pallas_src>

<mosaic_0001>
module attributes {stable_mosaic.version = 11 : i64} {
  func.func @_gemm_kernel(%arg0: i32, %arg1: i32, %arg2: memref<128x256xbf16, #tpu.memory_space<vmem>>, %arg3: memref<256x128xbf16, #tpu.memory_space<vmem>>, %arg4: memref<1x128xf32, #tpu.memory_space<vmem>>, %arg5: memref<1x128xf32, #tpu.memory_space<vmem>>, %arg6: memref<128x128xbf16, #tpu.memory_space<vmem>>) attributes {dimension_semantics = [#tpu.dimension_semantics<parallel>, #tpu.dimension_semantics<parallel>], iteration_bounds = array<i64: 4, 1>, scalar_prefetch = 0 : i64, scratch_operands = 0 : i64, tpu.core_type = #tpu.core_type<tc>, window_params = [{transform_indices = @transform_0, window_bounds = array<i64: 128, 256>}, {transform_indices = @transform_1, window_bounds = array<i64: 256, 128>}, {transform_indices = @transform_2, window_bounds = array<i64: 1, 128>}, {transform_indices = @transform_3, window_bounds = array<i64: 1, 128>}, {transform_indices = @transform_4, window_bounds = array<i64: 128, 128>}]} {
    %c0 = arith.constant 0 : index
    %c0_0 = arith.constant 0 : index
    %0 = vector.load %arg2[%c0, %c0_0] : memref<128x256xbf16, #tpu.memory_space<vmem>>, vector<128x256xbf16>
    %c0_1 = arith.constant 0 : index
    %c0_2 = arith.constant 0 : index
    %1 = vector.load %arg3[%c0_1, %c0_2] : memref<256x128xbf16, #tpu.memory_space<vmem>>, vector<256x128xbf16>
    %cst = arith.constant dense<0.000000e+00> : vector<128x128xf32>
    %2 = tpu.matmul %0, %1, %cst {dimension_numbers = #tpu.dot_dimension_numbers<[1], [0], [0], [1], [0, 0, 1, 1], [], []>} : vector<128x256xbf16>, vector<256x128xbf16>, vector<128x128xf32> -> vector<128x128xf32>
    %c0_3 = arith.constant 0 : index
    %c0_4 = arith.constant 0 : index
    %3 = vector.load %arg4[%c0_3, %c0_4] : memref<1x128xf32, #tpu.memory_space<vmem>>, vector<1x128xf32>
    %4 = vector.broadcast %3 : vector<1x128xf32> to vector<128x128xf32>
    %5 = arith.mulf %2, %4 : vector<128x128xf32>
    %c0_5 = arith.constant 0 : index
    %c0_6 = arith.constant 0 : index
    %6 = vector.load %arg5[%c0_5, %c0_6] : memref<1x128xf32, #tpu.memory_space<vmem>>, vector<1x128xf32>
    %7 = vector.broadcast %6 : vector<1x128xf32> to vector<128x128xf32>
    %8 = arith.addf %5, %7 : vector<128x128xf32>
    %cst_7 = arith.constant 0.000000e+00 : f32
    %9 = vector.broadcast %cst_7 : f32 to vector<128x128xf32>
    %10 = arith.maximumf %8, %9 : vector<128x128xf32>
    %11 = arith.truncf %10 : vector<128x128xf32> to vector<128x128xbf16>
    %c0_8 = arith.constant 0 : index
    %c0_9 = arith.constant 0 : index
    %12 = vector.load %arg6[%c0_8, %c0_9] : memref<128x128xbf16, #tpu.memory_space<vmem>>, vector<128x128xbf16>
    tpu.vector_store %arg6[%c0_8, %c0_9], %11 {strides = array<i32>} : memref<128x128xbf16, #tpu.memory_space<vmem>>, vector<128x128xbf16>,
    return
  }
  func.func @transform_0(%arg0: i32, %arg1: i32) -> (i32, i32) {
    %c0_i32 = arith.constant 0 : i32
    %c0_i32_0 = arith.constant 0 : i32
    return %arg0, %c0_i32 : i32, i32
  }
  func.func @transform_1(%arg0: i32, %arg1: i32) -> (i32, i32) {
    %c0_i32 = arith.constant 0 : i32
    %c0_i32_0 = arith.constant 0 : i32
    return %c0_i32, %arg1 : i32, i32
  }
  func.func @transform_2(%arg0: i32, %arg1: i32) -> (i32, i32) {
    %c0_i32 = arith.constant 0 : i32
    %c0_i32_0 = arith.constant 0 : i32
    return %c0_i32, %arg1 : i32, i32
  }
  func.func @transform_3(%arg0: i32, %arg1: i32) -> (i32, i32) {
    %c0_i32 = arith.constant 0 : i32
    %c0_i32_0 = arith.constant 0 : i32
    return %c0_i32, %arg1 : i32, i32
  }
  func.func @transform_4(%arg0: i32, %arg1: i32) -> (i32, i32) {
    %c0_i32 = arith.constant 0 : i32
    return %arg0, %arg1 : i32, i32
  }
}

</mosaic_0001>

<bundles_post_ra>
// kernel: tpu_custom_call.1
= control target key start
LH: loop header
LB: loop body
LE: loop exit
PB: predicated region body
PF: predicated region fallthrough
CT: control target
= control target key end

     0   :  { %s1641_s0 = inlined_call_operand.hbm [shape: bf16[512,256], index: 0, kind: input, shape index: {}]   ;;  %s1642_s1 = inlined_call_operand.hbm [shape: bf16[256,128], index: 1, kind: input, shape index: {}]   ;;  %s1643_s2 = inlined_call_operand.vmem [shape: f32[1,128], index: 2, kind: input, shape index: {}]   ;;  %s1644_s3 = inlined_call_operand.vmem [shape: f32[1,128], index: 3, kind: input, shape index: {}]   ;;  %s1645_s4 = inlined_call_operand.hbm [shape: bf16[512,128], index: 4, kind: output, shape index: {}]  }
   0x1   :  { %1647 = sst [smem:[#allocation11_spill]] %s1642_s1 }
   0x2   :  { %9 = vsyncpa [#allocation3], 0 }
   0x3   :  { %11 = vsyncpa [#allocation3 + $0x1], 0 }
   0x4   :  { %12 = vsyncpa [#allocation6], 0 }
   0x5   :  { %13 = vsyncpa [#allocation4], 0 }
   0x6   :  { %15 = vsyncpa [#allocation4 + $0x1], 0  ;;  %s1390_s15 = smov 0   ;;  %s1392_s16 = smov 0  }
   0x7   :  { %s1394_s17 = smov 0   ;;  %s1396_s18 = smov 0  }
   0x8   :  { %s1398_s19 = smov 0   ;;  %s1400_s20 = smov 0  }
   0x9 LB: > { %s881_s21 = sadd.s32 4294967295, %s1354_s20   ;;  %s882_s22 = sadd.s32 4294967294, %s1354_s20   ;;  %s1354_s20 = sphi %s1400_s20, %s21_s20   ;;  %s1350_s19 = sphi %s1398_s19, %s1664_s19   ;;  %s1346_s18 = sphi %s1396_s18, %s1663_s18   ;;  %s1342_s17 = sphi %s1394_s17, %s1662_s17   ;;  %s1338_s16 = sphi %s1392_s16, %s1661_s16   ;;  %s1334_s15 = sphi %s1390_s15, %s1660_s15  }
   0xa   : > { %p53_p0 = scmp.ne.s32.totalorder %s1338_s16, %s1334_s15  ;;  %p1424_p1 = scmp.eq.s32.totalorder %s881_s21, 0 }
   0xb   : > { %p1428_p2 = scmp.eq.s32.totalorder %s881_s21, 3  ;;  %p163_p3 = scmp.eq.s32.totalorder %s882_s22, 3 }
   0xc   : > { %p1434_p4 = por %p1424_p1, %p53_p0  ;;  %p883_p5 = scmp.ge.s32.totalorder %s1354_s20, 1 }
   0xd   : > { %p1439_p6 = por %p163_p3, %p53_p0  ;;  %p170_p7 = scmp.lt.s32.totalorder %s1354_s20, 5 }
   0xe   : > { %s1356_s28 = smov [#allocation5]   ;;  %s33_s5 = sadd.s32 1, %s1350_s19 }
   0xf   : > { %s1651_s26 = scalar_select %p1439_p6, 1, 0 }
  0x10   : > { %p1444_p8 = pnand %p883_p5, %p170_p7  ;;  %s184_s29 = sshll.u32 %s1356_s28, 4  ;;  %s185_s29 = int_to_ptr.vmem [resolvable:$true] %s184_s29 }
  0x11   : > { %s1227_s6 = scalar_lea.vmem %s185_s29, 2048  ;;  %p1235_p3 = scmp.lt.s32.totalorder %s185_s29, %s185_s29 }
  0x12   : > { %p1105_p9 = pneg %p1444_p8  ;;  %p1228_p12 = scmp.ne.s32.totalorder %s185_s29, %s1227_s6 }
  0x13   : > { %p1236_p5 = scmp.lt.s32.totalorder %s1227_s6, %s1227_s6 }
  0x14   : > { %p1452_p10 = pnand %p1105_p9, %p1424_p1 }
  0x15   : > { %p1237_p7 = por %p1236_p5, %p1235_p3 }
  0x16   : > { %p1218_p11 = pneg %p1452_p10 }
  0x18   : > { %p1230_p13 = pnand %p1228_p12, %p1218_p11 }
  0x1a   : > { %p1231_p0 = pneg %p1230_p13 }
  0x1c   : > { %p1238_p6 = pnand %p1237_p7, %p1231_p0 }
  0x1e   : > { %1241 = shalt.err (!%p1238_p6)
}
  0x1f   : > { %s1357_s7 = smov 64   ;;  %s1358_s8 = smov 4  }
  0x20   : > { %s1654_s1 = sld [smem:[#allocation11_spill]]  ;;  %p35_p9 = scmp.ge.s32.totalorder %s33_s5, 4 }
  0x21   : > { %s40_s11 = sadd.s32 1, %s1342_s17  ;;  %p47_p6 = scmp.ne.s32.totalorder %s1342_s17, %s1338_s16 }
  0x22   : > { %p48_p11 = scmp.eq.s32.totalorder %s1354_s20, 0  ;;  %s1666_s5 = smov (%p35_p9, %s33_s5), 0 }
  0x23   : > { %p1476_p13 = por %p1428_p2, %p47_p6  ;;  %s37_s14 = ssub.s32 %s1350_s19, %s1666_s5 }
  0x24   : > { %p1470_p12 = por %p48_p11, %p47_p6  ;;  %p1118_p0 = scmp.lt.s32.totalorder %s1354_s20, 4 }
  0x25   : > { %s1656_s13 = scalar_select %p1476_p13, 1, 0 }
  0x26   : > { %1108 = dma.hbm_to_vmem [thread:$0]  (!%p1452_p10), %s1654_s1, 2048, %s185_s29, [#allocation6], %s1357_s7, %s1357_s7, %s1358_s8  }
  0x27   : > { %p38_p10 = scmp.eq.s32.totalorder %s37_s14, 0  ;;  %s210_s21 = sand.u32 1, %s1342_s17  }
  0x28   : > { %s888_s22 = sshll.u32 %s210_s21, 7  ;;  %s952_s29 = sshll.u32 %s1350_s19, 11 }
  0x29   : > { %s1485_s28 = scalar_select %p38_p10, %s1342_s17, %s40_s11  }
  0x2a   : > { %s221_s7 = scalar_lea.hbm %s1641_s0, %s952_s29  ;;  %s214_s8 = scalar_lea.vmem [#allocation2], %s888_s22 }
  0x2b   : > { %s222_s9 = sshll.u32 %s214_s8, 4  ;;  %p1493_p2 = pnand %p1118_p0, %p1470_p12  ;;  %s223_s9 = int_to_ptr.vmem [resolvable:$true] %s222_s9 }
  0x2c   : > { %s211_s10 = scalar_lea.sflag [#allocation3], %s210_s21  ;;  %s1255_s14 = scalar_lea.vmem %s223_s9, 2048 }
  0x2d   : > { %p1244_p3 = pneg %p1493_p2  ;;  %p1256_p5 = scmp.ne.s32.totalorder %s223_s9, %s1255_s14 }
  0x2e   : > { %s1359_s11 = smov [#allocation2]  }
  0x2f   : > { %p1258_p7 = pnand %p1256_p5, %p1244_p3  ;;  %s1260_s1 = sshll.u32 %s1359_s11, 4  ;;  %s1261_s1 = int_to_ptr.vmem [resolvable:$false] %s1260_s1 }
  0x30   : > { %s1262_s29 = scalar_lea.vmem %s1261_s1, 4096  ;;  %p1263_p6 = scmp.lt.s32.totalorder %s223_s9, %s1261_s1 }
  0x31   : > { %p1259_p9 = pneg %p1258_p7  ;;  %p1264_p11 = scmp.lt.s32.totalorder %s1262_s29, %s1255_s14 }
  0x33   : > { %p1265_p10 = por %p1264_p11, %p1263_p6 }
  0x35   : > { %p1266_p13 = pnand %p1265_p10, %p1259_p9 }
  0x37   : > { %1269 = shalt.err (!%p1266_p13)
}
  0x38   : > { %s1360_s12 = smov 128   ;;  %s1361_s22 = smov 8  }
  0x39   : > { %1112 = dma.hbm_to_vmem [thread:$0]  (!%p1493_p2), %s221_s7, 2048, %s223_s9, %s211_s10, %s1360_s12, %s1360_s12, %s1361_s22  }
  0x3a   : > { %234 = sbr.rel (%p1444_p8) target bundleno = 346 (0x15a), region = 36  ;;  %s1504_s21 = sand.u32 (!%p1444_p8), 1, %s1338_s16  }
  0x3b   : > { %s893_s30 = sshll.u32 (!%p1444_p8), %s1504_s21, 7  ;;  %s237_s1 = scalar_lea.sflag (!%p1444_p8), [#allocation3], %s1504_s21 }
  0x3c   : > { %s1508_s6 = scalar_lea.vmem (!%p1444_p8), [#allocation2], %s893_s30 }
  0x3f   : > { %1321 = dma.done.wait (%p1434_p4), %s237_s1, 2048  }
  0x40   : > { %1323 = vsyncadd (%p1434_p4), %s237_s1, 4294965248 }
  0x41   : > { %1325 = dma.done.wait (%p1424_p1), [#allocation6], 2048  }
  0x42   : > { %1327 = vsyncadd (%p1424_p1), [#allocation6], 4294965248  ;;  %v1176_v0 = vld [vmem:[#allocation5 + $0x78] sm:$0xff]   ;;  %v1178_v2 = vld [vmem:[#allocation5 + $0x70] sm:$0xff]   ;;  %s895_s8 = sshll.u32 %s1504_s21, 6  ;;  %s969_s24 = sshll.u32 %s1346_s18, 10 }
  0x43   : > { %v1177_v1 = vld [vmem:[#allocation5 + $0x38] sm:$0xff]   ;;  %1017 = vmatprep.subr.bf16.mxu0 %v1176_v0  ;;  %1081 = vmatprep.subr.bf16.mxu1 %v1176_v0  ;;  %v1179_v3 = vld [vmem:[#allocation5 + $0x30] sm:$0xff]   ;;  %v1180_v4 = vld [vmem:[#allocation5 + $0x68] sm:$0xff]   ;;  %s1555_s9 = scalar_lea.vmem [#allocation7], %s895_s8  ;;  %s1590_s29 = scalar_lea.hbm %s1645_s4, %s969_s24 }
  0x44   : > { %1018 = vmatpush3.bf16.msra.mxu0 %v1177_v1  ;;  %1089 = vmatpush3.bf16.msra.mxu1 %v1177_v1  ;;  %v1181_v5 = vld [vmem:[#allocation5 + $0x28] sm:$0xff]   ;;  %v1182_v6 = vld [vmem:[#allocation5 + $0x60] sm:$0xff]   ;;  %v1184_v8 = vld [vmem:[#allocation5 + $0x58] sm:$0xff]   ;;  %s762_s10 = sshll.u32 %s1555_s9, 4  ;;  %s748_s18 = scalar_lea.sflag [#allocation4], %s1504_s21  ;;  %s1592_s10 = int_to_ptr.vmem [resolvable:$true] %s762_s10 }
  0x45   : > { %1019 = vmatprep.subr.bf16.mxu0 %v1178_v2  ;;  %1082 = vmatprep.subr.bf16.mxu1 %v1178_v2  ;;  %v1183_v7 = vld [vmem:[#allocation5 + $0x20] sm:$0xff]   ;;  %v1185_v9 = vld [vmem:[#allocation5 + $0x18] sm:$0xff]   ;;  %v1186_v10 = vld [vmem:[#allocation5 + $0x50] sm:$0xff]   ;;  %s1270_s12 = scalar_lea.vmem %s1592_s10, 1024  ;;  %p1658_p4 = scmp.ne.s32.totalorder %s1656_s13, 0 }
  0x46   : > { %v1194_v11 = vld [vmem:[%s1508_s6 + $0x4] ss:$8 sps:$4 sm:$0xff]   ;;  %v1187_v13 = vld [vmem:[#allocation5 + $0x10] sm:$0xff]   ;;  %v1192_v18 = vld [vmem:[%s1508_s6] ss:$8 sps:$4 sm:$0xff]   ;;  %p1271_p1 = scmp.ne.s32.totalorder %s1592_s10, %s1270_s12  ;;  %s1362_s22 = smov [#allocation7]  }
  0x47   : > { %v1197_v12 = vld [vmem:[%s1508_s6 + $0x44] ss:$8 sps:$4 sm:$0xff]   ;;  %540 = vmatprep.mubr.bf16.mxu0 %v1194_v11  ;;  %v1195_v19 = vld [vmem:[%s1508_s6 + $0x40] ss:$8 sps:$4 sm:$0xff]   ;;  %v1198_v20 = vld [vmem:[%s1508_s6 + $0x14] ss:$8 sps:$4 sm:$0xff]  }
  0x48   : > { %1020 = vmatpush3.bf16.msra.mxu0 %v1179_v3  ;;  %1090 = vmatpush3.bf16.msra.mxu1 %v1179_v3  ;;  %v1188_v14 = vld [vmem:[#allocation5 + $0x48] sm:$0xff]   ;;  %v1190_v16 = vld [vmem:[#allocation5 + $0x40] sm:$0xff]   ;;  %v1200_v21 = vld [vmem:[%s1508_s6 + $0x54] ss:$8 sps:$4 sm:$0xff]   ;;  %p1272_p8 = pnand %p1271_p1, %p1658_p4  ;;  %s1274_s30 = sshll.u32 %s1362_s22, 4  ;;  %s1275_s30 = int_to_ptr.vmem [resolvable:$false] %s1274_s30 }
  0x49   : > { %1021 = vmatprep.subr.bf16.mxu0 %v1180_v4  ;;  %1083 = vmatprep.subr.bf16.mxu1 %v1180_v4  ;;  %v1189_v15 = vld [vmem:[#allocation5 + $0x8] sm:$0xff]   ;;  %v1191_v17 = vld [vmem:[#allocation5] sm:$0xff]   ;;  %v1202_v22 = vld [vmem:[%s1508_s6 + $0x10] ss:$8 sps:$4 sm:$0xff]   ;;  %s1276_s1 = scalar_lea.vmem %s1275_s30, 2048  ;;  %p1277_p13 = scmp.lt.s32.totalorder %s1592_s10, %s1275_s30 }
  0x4a   : > { %572 = vmatprep.mubr.bf16.mxu1 %v1197_v12  ;;  %v1203_v23 = vld [vmem:[%s1508_s6 + $0x50] ss:$8 sps:$4 sm:$0xff]   ;;  %v1204_v24 = vld [vmem:[%s1508_s6 + $0x24] ss:$8 sps:$4 sm:$0xff]   ;;  %v1208_v26 = vld [vmem:[%s1508_s6 + $0x20] ss:$8 sps:$4 sm:$0xff]   ;;  %p1273_p12 = pneg %p1272_p8  ;;  %p1278_p0 = scmp.lt.s32.totalorder %s1276_s1, %s1270_s12 }
  0x4b   : > { %v1206_v25 = vld [vmem:[%s1508_s6 + $0x64] ss:$8 sps:$4 sm:$0xff]   ;;  %v1209_v27 = vld [vmem:[%s1508_s6 + $0x60] ss:$8 sps:$4 sm:$0xff]   ;;  %v1210_v28 = vld [vmem:[%s1508_s6 + $0x34] ss:$8 sps:$4 sm:$0xff]  }
  0x4c   : > { %1022 = vmatpush3.bf16.msra.mxu0 %v1181_v5  ;;  %1091 = vmatpush3.bf16.msra.mxu1 %v1181_v5  ;;  %v1212_v29 = vld [vmem:[%s1508_s6 + $0x74] ss:$8 sps:$4 sm:$0xff]   ;;  %v1214_v30 = vld [vmem:[%s1508_s6 + $0x30] ss:$8 sps:$4 sm:$0xff]   ;;  %v1537_v35 = vld [vmem:[%s1643_s2] ss:$0 sm:$0xff]  ;;  %p1279_p2 = por %p1278_p0, %p1277_p13 }
  0x4d   : > { %1023 = vmatprep.subr.bf16.mxu0 %v1182_v6  ;;  %1084 = vmatprep.subr.bf16.mxu1 %v1182_v6  ;;  %v1215_v31 = vld [vmem:[%s1508_s6 + $0x70] ss:$8 sps:$4 sm:$0xff]   ;;  %v1544_v43 = vld [vmem:[%s1644_s3] ss:$0 sm:$0xff] }
  0x4e   : > { %p1280_p3 = pnand %p1279_p2, %p1273_p12 }
  0x50   : > { %1024 = vmatpush3.bf16.msra.mxu0 %v1183_v7  ;;  %1092 = vmatpush3.bf16.msra.mxu1 %v1183_v7 }
  0x51   : > { %1025 = vmatprep.subr.bf16.mxu0 %v1184_v8  ;;  %1085 = vmatprep.subr.bf16.mxu1 %v1184_v8 }
  0x54   : > { %1026 = vmatpush3.bf16.msra.mxu0 %v1185_v9  ;;  %1093 = vmatpush3.bf16.msra.mxu1 %v1185_v9 }
  0x55   : > { %1027 = vmatprep.subr.bf16.mxu0 %v1186_v10  ;;  %1086 = vmatprep.subr.bf16.mxu1 %v1186_v10 }
  0x58   : > { %1028 = vmatpush3.bf16.msra.mxu0 %v1187_v13  ;;  %1094 = vmatpush3.bf16.msra.mxu1 %v1187_v13 }
  0x59   : > { %1029 = vmatprep.subr.bf16.mxu0 %v1188_v14  ;;  %1087 = vmatprep.subr.bf16.mxu1 %v1188_v14 }
  0x5c   : > { %1030 = vmatpush3.bf16.msra.mxu0 %v1189_v15  ;;  %1095 = vmatpush3.bf16.msra.mxu1 %v1189_v15 }
  0x5d   : > { %1031 = vmatprep.subr.bf16.mxu0 %v1190_v16  ;;  %1088 = vmatprep.subr.bf16.mxu1 %v1190_v16 }
  0x60   : > { %1032 = vmatpush3.bf16.msra.mxu0 %v1191_v17  ;;  %1096 = vmatpush3.bf16.msra.mxu1 %v1191_v17 }
  0x63   : > { %541 = vmatmul.mubr.bf16.vlgmr.msra.gmra.mxu0 %v1192_v18  ;;  %573 = vmatmul.mubr.bf16.vlgmr.msra.gmra.mxu1 %v1195_v19 }
  0x64   : > { %548 = vmatprep.mubr.bf16.mxu0 %v1198_v20  ;;  %580 = vmatprep.mubr.bf16.mxu1 %v1200_v21 }
  0x6b   : > { %549 = vmatmul.mubr.bf16.gmra.mxu0 %v1202_v22  ;;  %581 = vmatmul.mubr.bf16.gmra.mxu1 %v1203_v23 }
  0x6c   : > { %556 = vmatprep.mubr.bf16.mxu0 %v1204_v24  ;;  %588 = vmatprep.mubr.bf16.mxu1 %v1206_v25 }
  0x73   : > { %557 = vmatmul.mubr.bf16.gmra.mxu0 %v1208_v26  ;;  %589 = vmatmul.mubr.bf16.gmra.mxu1 %v1209_v27 }
  0x74   : > { %564 = vmatprep.mubr.bf16.mxu0 %v1210_v28  ;;  %596 = vmatprep.mubr.bf16.mxu1 %v1212_v29 }
  0x7b   : > { %565 = vmatmul.mubr.bf16.gmra.mxu0 %v1214_v30  ;;  %597 = vmatmul.mubr.bf16.gmra.mxu1 %v1215_v31 }
 0x123   : > { %v1033_v32 = vpop.f32.mrf.mxu0  ;;  %v1057_v33 = vpop.f32.mrf.mxu1 }
 0x125   : > { %v1034_v34 = vpop.f32.mrf.mxu0  ;;  %v1058_v36 = vpop.f32.mrf.mxu1 }
 0x126   : > { %v1035_v37 = vadd.f32 %v1034_v34, %v1033_v32  ;;  %v1059_v38 = vadd.f32 %v1058_v36, %v1057_v33 }
 0x127   : > { %v1036_v39 = vpop.f32.mrf.mxu0  ;;  %v1060_v40 = vpop.f32.mrf.mxu1 }
 0x128   : > { %v612_v41 = vmul.f32 %v1035_v37, %v1537_v35  ;;  %v620_v42 = vmul.f32 %v1059_v38, %v1537_v35 }
 0x129   : > { %v1037_v44 = vpop.f32.mrf.mxu0  ;;  %v1061_v45 = vpop.f32.mrf.mxu1 }
 0x12a   : > { %v1038_v46 = vadd.f32 %v1037_v44, %v1036_v39  ;;  %v1062_v47 = vadd.f32 %v1061_v45, %v1060_v40  ;;  %v635_v50 = vadd.f32 %v1544_v43, %v612_v41  ;;  %v643_v51 = vadd.f32 %v1544_v43, %v620_v42 }
 0x12b   : > { %v1039_v48 = vpop.f32.mrf.mxu0  ;;  %v1063_v49 = vpop.f32.mrf.mxu1 }
 0x12c   : > { %v613_v52 = vmul.f32 %v1038_v46, %v1537_v35  ;;  %v621_v53 = vmul.f32 %v1062_v47, %v1537_v35  ;;  %v651_v62 = vmax.f32 %v635_v50, 0.0  ;;  %v659_v63 = vmax.f32 %v643_v51, 0.0 }
 0x12d   : > { %v1040_v54 = vpop.f32.mrf.mxu0  ;;  %v1064_v55 = vpop.f32.mrf.mxu1 }
 0x12e   : > { %v636_v56 = vadd.f32 %v1544_v43, %v613_v52  ;;  %v644_v57 = vadd.f32 %v1544_v43, %v621_v53  ;;  %v1041_v58 = vadd.f32 %v1040_v54, %v1039_v48  ;;  %v1065_v59 = vadd.f32 %v1064_v55, %v1063_v49 }
 0x12f   : > { %v1042_v60 = vpop.f32.mrf.mxu0  ;;  %v1066_v61 = vpop.f32.mrf.mxu1 }
 0x130   : > { %v652_v0 = vmax.f32 %v636_v56, 0.0  ;;  %v660_v1 = vmax.f32 %v644_v57, 0.0  ;;  %v614_v2 = vmul.f32 %v1041_v58, %v1537_v35  ;;  %v622_v3 = vmul.f32 %v1065_v59, %v1537_v35 }
 0x131   : > { %v1043_v4 = vpop.f32.mrf.mxu0  ;;  %v1067_v5 = vpop.f32.mrf.mxu1 }
 0x132   : > { %v973_v6 = vpack.c.bf16 %v652_v0, %v651_v62  ;;  %v993_v7 = vpack.c.bf16 %v660_v1, %v659_v63  ;;  %v1044_v8 = vadd.f32 %v1043_v4, %v1042_v60  ;;  %v1068_v9 = vadd.f32 %v1067_v5, %v1066_v61 }
 0x133   : > { %v1045_v10 = vpop.f32.mrf.mxu0  ;;  %v1069_v11 = vpop.f32.mrf.mxu1  ;;  %v637_v12 = vadd.f32 %v1544_v43, %v614_v2  ;;  %v645_v13 = vadd.f32 %v1544_v43, %v622_v3 }
 0x134   : > { %974 = vst [vmem:[%s1555_s9] sm:$0xff] %v973_v6   ;;  %1013 = vst [vmem:[%s1555_s9 + $0x20] sm:$0xff] %v993_v7   ;;  %v615_v14 = vmul.f32 %v1044_v8, %v1537_v35  ;;  %v623_v15 = vmul.f32 %v1068_v9, %v1537_v35 }
 0x135   : > { %v1046_v16 = vpop.f32.mrf.mxu0  ;;  %v1070_v17 = vpop.f32.mrf.mxu1  ;;  %v653_v26 = vmax.f32 %v637_v12, 0.0  ;;  %v661_v27 = vmax.f32 %v645_v13, 0.0 }
 0x136   : > { %v1047_v18 = vadd.f32 %v1046_v16, %v1045_v10  ;;  %v1071_v19 = vadd.f32 %v1070_v17, %v1069_v11  ;;  %v638_v20 = vadd.f32 %v1544_v43, %v615_v14  ;;  %v646_v21 = vadd.f32 %v1544_v43, %v623_v15 }
 0x137   : > { %v1048_v22 = vpop.f32.mrf.mxu0  ;;  %v1072_v23 = vpop.f32.mrf.mxu1 }
 0x138   : > { %v616_v24 = vmul.f32 %v1047_v18, %v1537_v35  ;;  %v624_v25 = vmul.f32 %v1071_v19, %v1537_v35  ;;  %v654_v28 = vmax.f32 %v638_v20, 0.0  ;;  %v662_v29 = vmax.f32 %v646_v21, 0.0 }
 0x139   : > { %v1049_v30 = vpop.f32.mrf.mxu0  ;;  %v1073_v31 = vpop.f32.mrf.mxu1 }
 0x13a   : > { %v1050_v32 = vadd.f32 %v1049_v30, %v1048_v22  ;;  %v1074_v33 = vadd.f32 %v1073_v31, %v1072_v23  ;;  %v978_v34 = vpack.c.bf16 %v654_v28, %v653_v26  ;;  %v998_v36 = vpack.c.bf16 %v662_v29, %v661_v27 }
 0x13b   : > { %v1051_v37 = vpop.f32.mrf.mxu0  ;;  %v1075_v38 = vpop.f32.mrf.mxu1  ;;  %v639_v39 = vadd.f32 %v1544_v43, %v616_v24  ;;  %v647_v40 = vadd.f32 %v1544_v43, %v624_v25 }
 0x13c   : > { %v617_v41 = vmul.f32 %v1050_v32, %v1537_v35  ;;  %v625_v42 = vmul.f32 %v1074_v33, %v1537_v35  ;;  %1010 = vst [vmem:[%s1555_s9 + $0x8] sm:$0xff] %v978_v34   ;;  %1014 = vst [vmem:[%s1555_s9 + $0x28] sm:$0xff] %v998_v36  }
 0x13d   : > { %v1052_v44 = vpop.f32.mrf.mxu0  ;;  %v1076_v45 = vpop.f32.mrf.mxu1  ;;  %v655_v52 = vmax.f32 %v639_v39, 0.0  ;;  %v663_v53 = vmax.f32 %v647_v40, 0.0 }
 0x13e   : > { %v640_v46 = vadd.f32 %v1544_v43, %v617_v41  ;;  %v648_v47 = vadd.f32 %v1544_v43, %v625_v42  ;;  %v1053_v48 = vadd.f32 %v1052_v44, %v1051_v37  ;;  %v1077_v49 = vadd.f32 %v1076_v45, %v1075_v38 }
 0x13f   : > { %v1054_v50 = vpop.f32.mrf.mxu0  ;;  %v1078_v51 = vpop.f32.mrf.mxu1 }
 0x140   : > { %v656_v54 = vmax.f32 %v640_v46, 0.0  ;;  %v664_v55 = vmax.f32 %v648_v47, 0.0  ;;  %v618_v56 = vmul.f32 %v1053_v48, %v1537_v35  ;;  %v626_v57 = vmul.f32 %v1077_v49, %v1537_v35 }
 0x141   : > { %v1055_v58 = vpop.f32.mrf.mxu0  ;;  %v1079_v59 = vpop.f32.mrf.mxu1 }
 0x142   : > { %v983_v60 = vpack.c.bf16 %v656_v54, %v655_v52  ;;  %v1003_v61 = vpack.c.bf16 %v664_v55, %v663_v53  ;;  %v1056_v62 = vadd.f32 %v1055_v58, %v1054_v50  ;;  %v1080_v63 = vadd.f32 %v1079_v59, %v1078_v51 }
 0x143   : > { %v641_v0 = vadd.f32 %v1544_v43, %v618_v56  ;;  %v649_v1 = vadd.f32 %v1544_v43, %v626_v57 }
 0x144   : > { %1011 = vst [vmem:[%s1555_s9 + $0x10] sm:$0xff] %v983_v60   ;;  %1015 = vst [vmem:[%s1555_s9 + $0x30] sm:$0xff] %v1003_v61   ;;  %v619_v2 = vmul.f32 %v1056_v62, %v1537_v35  ;;  %v627_v3 = vmul.f32 %v1080_v63, %v1537_v35 }
 0x145   : > { %v657_v6 = vmax.f32 %v641_v0, 0.0  ;;  %v665_v7 = vmax.f32 %v649_v1, 0.0 }
 0x146   : > { %v642_v4 = vadd.f32 %v1544_v43, %v619_v2  ;;  %v650_v5 = vadd.f32 %v1544_v43, %v627_v3 }
 0x148   : > { %v658_v8 = vmax.f32 %v642_v4, 0.0  ;;  %v666_v9 = vmax.f32 %v650_v5, 0.0 }
 0x14a   : > { %v988_v35 = vpack.c.bf16 %v658_v8, %v657_v6  ;;  %v1008_v10 = vpack.c.bf16 %v666_v9, %v665_v7 }
 0x14c   : > { %1012 = vst [vmem:[%s1555_s9 + $0x18] sm:$0xff] %v988_v35   ;;  %1016 = vst [vmem:[%s1555_s9 + $0x38] sm:$0xff] %v1008_v10  }
 0x14d   : > { %1283 = shalt.err (!%p1280_p3)
}
 0x14e   : > { %s1284_s6 = scalar_lea.hbm %s1590_s29, 1024  ;;  %s1288_s27 = scalar_lea.hbm %s1645_s4, 4096 }
 0x14f   : > { %p1285_p5 = scmp.ne.s32.totalorder %s1590_s29, %s1284_s6  ;;  %p1289_p6 = scmp.lt.s32.totalorder %s1590_s29, %s1645_s4 }
 0x150   : > { %p1290_p11 = scmp.lt.s32.totalorder %s1288_s27, %s1284_s6 }
 0x151   : > { %p1286_p7 = pnand %p1285_p5, %p1658_p4 }
 0x152   : > { %p1291_p10 = por %p1290_p11, %p1289_p6 }
 0x153   : > { %p1287_p9 = pneg %p1286_p7 }
 0x155   : > { %p1292_p1 = pnand %p1291_p10, %p1287_p9 }
 0x157   : > { %1295 = shalt.err (!%p1292_p1)
}
 0x158   : > { %s1363_s9 = smov 64   ;;  %s1364_s24 = smov 4  }
 0x159   : > { %1103 = dma.vmem_to_hbm [thread:$0]  (%p1658_p4), %s1592_s10, 1024, %s1590_s29, %s748_s18, %s1363_s9, %s1363_s9, %s1364_s24  }
 0x15a PF: > { %p1120_p8 = scmp.ge.s32.totalorder %s1354_s20, 2  ;;  %s777_s14 = sand.u32 1, %s1334_s15  }
 0x15b   : > { %p1659_p12 = scmp.ne.s32.totalorder %s1651_s26, 0  ;;  %s778_s11 = scalar_lea.sflag [#allocation4], %s777_s14 }
 0x15d   : > { %p1114_p13 = pnand %p1120_p8, %p1659_p12 }
 0x15f   : > { %p1115_p0 = pneg %p1114_p13 }
 0x161   : > { %1329 = dma.done.wait (%p1115_p0), %s778_s11, 1024  }
 0x162   : > { %1331 = vsyncadd (%p1115_p0), %s778_s11, 4294966272  ;;  %s21_s20 = sadd.s32 1, %s1354_s20   ;;  %s1660_s15 = smov %s1338_s16 }
 0x163   : > { %p18_p2 = scmp.ge.s32.totalorder %s21_s20, 6   ;;  %s1661_s16 = smov %s1342_s17 }
 0x164   : > { %s1662_s17 = smov %s1485_s28  ;;  %s1663_s18 = smov %s1350_s19 }
 0x165   : > { %s1664_s19 = smov %s1666_s5  ;;  %20 = sbr.rel (!%p18_p2) target bundleno = 9 (0x9), region = 92 }
 0x16a   :  { %783 = vsyncpa [#allocation3], 1 }
 0x16b   :  { %785 = vsyncpa [#allocation3 + $0x1], 1 }
 0x16c   :  { %786 = vsyncpa [#allocation6], 1 }
 0x16d   :  { %787 = vsyncpa [#allocation4], 1 }
 0x16e   :  { %789 = vsyncpa [#allocation4 + $0x1], 1 }

</bundles_post_ra>
